<compile_context>
chip_gen: v5e
topology: v5e:2x2
jax: 0.10.0
libtpu: 0.0.40
codegen_flags: <defaults>
</compile_context>

<pallas_src>
import functools

import jax
import jax.numpy as jnp
from jax.experimental import pallas as pl
from jax.experimental.pallas import tpu as pltpu

_LANES = 1024              # lane-dense last dim (multiple of 128)
_MAX_BLOCK_ROWS = 2048     # (2048, 1024) f32 tile = 8 MiB
_MIN_KERNEL_ELEMS = 1 << 20  # below ~1M elems, fused XLA beats a pallas_call


def _round_up(n, m):
    return ((n + m - 1) // m) * m


def _cdiv(a, b):
    return -(-a // b)


def linear_affine_kernel(w_ref, b_ref, x_ref, o_ref):
    # w_ref / b_ref: (1, 1) f32 scalars in SMEM.
    # x_ref / o_ref: (block_rows, _LANES) tiles in VMEM.
    w = w_ref[0, 0]
    b = b_ref[0, 0]
    y = x_ref[...].astype(jnp.float32) * w + b            # f32 fma on the VPU
    o_ref[...] = y.astype(o_ref.dtype)


@functools.partial(jax.jit, static_argnames=("force_kernel",))
def linear_forward(x, weight, bias, *, force_kernel=False):
    """y = x @ weight.T + bias with torch.nn.Linear(1, 1) semantics.

    x: (..., 1); weight: (1, 1); bias: (1,). Returns an array of x.shape.
    """
    orig_shape = x.shape
    assert orig_shape[-1] == 1 and weight.shape == (1, 1) and bias.shape == (1,)
    n = x.size

    lane_aligned = n > 0 and (n % _LANES == 0)

    # Fast path: small or ragged inputs -> single fused XLA elementwise op
    # (no pallas_call launch cost, no pad/slice HBM passes).
    if not force_kernel and (n < _MIN_KERNEL_ELEMS or not lane_aligned):
        w = weight.reshape(()).astype(jnp.float32)
        b = bias.reshape(()).astype(jnp.float32)
        return (x.astype(jnp.float32) * w + b).astype(x.dtype)

    # ------------------------- Pallas kernel path -------------------------
    x_flat = x.reshape(-1)
    if lane_aligned:
        rows = n // _LANES
        x_slab = x_flat.reshape(rows, _LANES)      # metadata-only reshape
        needs_tail = False
    else:
        # Only reachable with force_kernel on ragged sizes (e.g. tiny demo).
        padded_n = _round_up(max(n, 1), _LANES)
        rows = padded_n // _LANES
        x_slab = jnp.pad(x_flat, (0, padded_n - n)).reshape(rows, _LANES)
        needs_tail = True

    # Tile sizing: >= 2 parallel tiles when possible (both v7x TCs stream),
    # capped at 8 MiB f32 tiles; cdiv grid with Pallas edge-block masking.
    if rows <= 8:
        block_rows = rows                          # single block == full dim
    else:
        num_tiles = max(2, _cdiv(rows, _MAX_BLOCK_ROWS))
        block_rows = min(_MAX_BLOCK_ROWS,
                         _round_up(_cdiv(rows, num_tiles), 8))
    grid = (_cdiv(rows, block_rows),)

    itemsize = jnp.dtype(x.dtype).itemsize
    n_eff = rows * _LANES
    cost = pl.CostEstimate(flops=2 * n_eff,
                           transcendentals=0,
                           bytes_accessed=2 * n_eff * itemsize)

    # Keep parameters in f32 SMEM so low-precision x doesn't degrade w/b.
    w = weight.reshape(1, 1).astype(jnp.float32)
    b = bias.reshape(1, 1).astype(jnp.float32)

    call_kwargs = {}
    if needs_tail:
        # Padded slab is a fresh intermediate (dead after the call): reuse
        # its HBM buffer for the output.  Never alias the zero-copy view of
        # the caller's x.
        call_kwargs["input_output_aliases"] = {2: 0}

    y_slab = pl.pallas_call(
        linear_affine_kernel,
        out_shape=jax.ShapeDtypeStruct((rows, _LANES), x.dtype),
        grid=grid,
        in_specs=[
            pl.BlockSpec(memory_space=pltpu.MemorySpace.SMEM),     # weight
            pl.BlockSpec(memory_space=pltpu.MemorySpace.SMEM),     # bias
            pl.BlockSpec((block_rows, _LANES), lambda i: (i, 0)),  # x tile
        ],
        out_specs=pl.BlockSpec((block_rows, _LANES), lambda i: (i, 0)),
        compiler_params=pltpu.CompilerParams(
            dimension_semantics=("parallel",),
            vmem_limit_bytes=48 << 20,
        ),
        cost_estimate=cost,
        **call_kwargs,
    )(w, b, x_slab)

    if needs_tail:
        return y_slab.reshape(-1)[:n].reshape(orig_shape)
    return y_slab.reshape(orig_shape)


if __name__ == "__main__":
    key = jax.random.PRNGKey(0)
    kx, kw, kb, kx2, kx3 = jax.random.split(key, 5)

    # Deterministic parameter init (synthetic, not a checkpoint load).
    weight = jax.random.normal(kw, (1, 1), dtype=jnp.float32)  # (out, in)
    bias = jax.random.normal(kb, (1,), dtype=jnp.float32)      # (out,)

    # 1) Primary: small lane-aligned batch through the Pallas kernel
    #    (zero-copy slab path, no pad / no slice).
    N = 2048
    x = jax.random.normal(kx, (N, 1), dtype=jnp.float32)
    y = jax.block_until_ready(linear_forward(x, weight, bias, force_kernel=True))
    y_ref = x @ weight.T + bias
    assert y.shape == (N, 1)
    assert jnp.allclose(y, y_ref, atol=1e-6, rtol=1e-6)

    # 2) Multi-tile grid path: rows=19 -> block_rows=16, grid=2 with a
    #    partial (masked) edge block and >= 2 parallel tiles.
    N2 = 19 * _LANES
    x2 = jax.random.normal(kx2, (N2, 1), dtype=jnp.float32)
    y2 = jax.block_until_ready(linear_forward(x2, weight, bias, force_kernel=True))
    assert jnp.allclose(y2, x2 @ weight.T + bias, atol=1e-6, rtol=1e-6)

    # 3) Ragged tiny batch: auto path takes the fused plain-JAX fast path.
    x3 = jax.random.normal(kx3, (8, 1), dtype=jnp.float32)
    y3 = jax.block_until_ready(linear_forward(x3, weight, bias))
    assert jnp.allclose(y3, x3 @ weight.T + bias, atol=1e-6, rtol=1e-6)

    print("KERNEL_OK")
</pallas_src>

<mosaic_0001>
module attributes {stable_mosaic.version = 11 : i64} {
  func.func @linear_affine_kernel(%arg0: i32, %arg1: memref<1x1xf32, #tpu.memory_space<smem>>, %arg2: memref<1x1xf32, #tpu.memory_space<smem>>, %arg3: memref<2x1024xf32, #tpu.memory_space<vmem>>, %arg4: memref<2x1024xf32, #tpu.memory_space<vmem>>) attributes {dimension_semantics = [#tpu.dimension_semantics<parallel>], iteration_bounds = array<i64: 1>, scalar_prefetch = 0 : i64, scratch_operands = 0 : i64, tpu.core_type = #tpu.core_type<tc>, window_params = [{transform_indices = @transform_0, window_bounds = array<i64: 1, 1>}, {transform_indices = @transform_1, window_bounds = array<i64: 1, 1>}, {transform_indices = @transform_2, window_bounds = array<i64: 2, 1024>}, {transform_indices = @transform_3, window_bounds = array<i64: 2, 1024>}]} {
    %c0 = arith.constant 0 : index
    %c0_0 = arith.constant 0 : index
    %0 = memref.load %arg1[%c0, %c0_0] : memref<1x1xf32, #tpu.memory_space<smem>>
    %c0_1 = arith.constant 0 : index
    %c0_2 = arith.constant 0 : index
    %1 = memref.load %arg2[%c0_1, %c0_2] : memref<1x1xf32, #tpu.memory_space<smem>>
    %c0_3 = arith.constant 0 : index
    %c0_4 = arith.constant 0 : index
    %2 = vector.load %arg3[%c0_3, %c0_4] : memref<2x1024xf32, #tpu.memory_space<vmem>>, vector<2x1024xf32>
    %3 = vector.broadcast %0 : f32 to vector<2x1024xf32>
    %4 = arith.mulf %2, %3 : vector<2x1024xf32>
    %5 = vector.broadcast %1 : f32 to vector<2x1024xf32>
    %6 = arith.addf %4, %5 : vector<2x1024xf32>
    %c0_5 = arith.constant 0 : index
    %c0_6 = arith.constant 0 : index
    %7 = vector.load %arg4[%c0_5, %c0_6] : memref<2x1024xf32, #tpu.memory_space<vmem>>, vector<2x1024xf32>
    tpu.vector_store %arg4[%c0_5, %c0_6], %6 {strides = array<i32>} : memref<2x1024xf32, #tpu.memory_space<vmem>>, vector<2x1024xf32>,
    return
  }
  func.func @transform_0(%arg0: i32) -> (i32, i32) {
    %c0_i32 = arith.constant 0 : i32
    %c0_i32_0 = arith.constant 0 : i32
    %c0_i32_1 = arith.constant 0 : i32
    return %c0_i32, %c0_i32_0 : i32, i32
  }
  func.func @transform_1(%arg0: i32) -> (i32, i32) {
    %c0_i32 = arith.constant 0 : i32
    %c0_i32_0 = arith.constant 0 : i32
    %c0_i32_1 = arith.constant 0 : i32
    return %c0_i32, %c0_i32_0 : i32, i32
  }
  func.func @transform_2(%arg0: i32) -> (i32, i32) {
    %c0_i32 = arith.constant 0 : i32
    %c0_i32_0 = arith.constant 0 : i32
    return %arg0, %c0_i32 : i32, i32
  }
  func.func @transform_3(%arg0: i32) -> (i32, i32) {
    %c0_i32 = arith.constant 0 : i32
    %c0_i32_0 = arith.constant 0 : i32
    return %arg0, %c0_i32 : i32, i32
  }
}

</mosaic_0001>

<bundles_post_ra>
// kernel: linear_forward.1
= control target key start
LH: loop header
LB: loop body
LE: loop exit
PB: predicated region body
PF: predicated region fallthrough
CT: control target
= control target key end

     0   :  { %s70_s0 = inlined_call_operand.<no memory space> [shape: f32[1,1], index: 0, kind: input, shape index: {}]   ;;  %s71_s1 = inlined_call_operand.<no memory space> [shape: f32[1,1], index: 1, kind: input, shape index: {}]   ;;  %s72_s2 = inlined_call_operand.vmem [shape: f32[2,1024], index: 2, kind: input, shape index: {}]   ;;  %s73_s3 = inlined_call_operand.vmem [shape: f32[2,1024], index: 3, kind: output, shape index: {}]  }
   0x1   :  { %v18_v0 = vld [vmem:[%s72_s2] sm:$0xff]  ;;  %v20_v1 = vstv %s70_s0  ;;  %v23_v2 = vstv %s71_s1  ;;  %v19_v3 = vld [vmem:[%s72_s2 + $0x8] sm:$0xff] }
   0x2   :  { %v21_v4 = vmul.f32 %v20_v1, %v18_v0  ;;  %v22_v5 = vmul.f32 %v20_v1, %v19_v3 }
   0x4   :  { %v24_v6 = vadd.f32 %v23_v2, %v21_v4  ;;  %v25_v7 = vadd.f32 %v23_v2, %v22_v5 }
   0x6   :  { %26 = vst [vmem:[%s73_s3] sm:$0xff] %v24_v6 }
   0x7   :  { %27 = vst [vmem:[%s73_s3 + $0x8] sm:$0xff] %v25_v7 }

</bundles_post_ra>
